<compile_context>
chip_gen: v7x
topology: tpu7x:2x2x1
jax: 0.10.0
libtpu: 0.0.40
codegen_flags: <defaults>
</compile_context>

<pallas_src>
import functools

import jax
import jax.numpy as jnp
from jax.experimental import pallas as pl
from jax.experimental.pallas import tpu as pltpu

_EPS = 1e-6      # F.pairwise_distance default eps
_MARGIN = 2.0    # module default

# Row-tile cap: large enough to amortize per-step overhead / hit the HBM
# roofline, small enough that 3 double-buffered (TN, D) f32 inputs stay well
# inside the scoped VMEM budget on v5e/v6e/v7x for typical D.
_MAX_TN = 512


def _make_kernel(n_rows, tile_rows, n_blocks, margin, eps):
    inv_n = 1.0 / float(n_rows)
    needs_mask = (n_rows % tile_rows) != 0

    def kernel(x1_ref, x2_ref, label_ref, out_ref, acc_ref):
        i = pl.program_id(0)

        @pl.when(i == 0)
        def _init():
            acc_ref[0, 0] = jnp.float32(0.0)

        x1 = x1_ref[...].astype(jnp.float32)         # (TN, D)
        x2 = x2_ref[...].astype(jnp.float32)         # (TN, D)
        label = label_ref[...].astype(jnp.float32)   # (TN, 1)

        # F.pairwise_distance: ||x1 - x2 + eps||_2 along last dim, keepdim.
        diff = x1 - x2 + eps
        sq_sum = jnp.sum(diff * diff, axis=-1, keepdims=True)   # (TN, 1)
        dist = jnp.sqrt(sq_sum)                                  # (TN, 1)

        # (1 - label) * d^2 + label * clamp(margin - d, 0)^2
        hinge = jnp.maximum(margin - dist, 0.0)
        per_row = (1.0 - label) * sq_sum + label * (hinge * hinge)  # (TN, 1)

        if needs_mask:
            # Zero out rows past the true batch size in the tail block.
            rows_left = n_rows - i * tile_rows
            row_ids = jax.lax.broadcasted_iota(jnp.int32, per_row.shape, 0)
            per_row = jnp.where(row_ids < rows_left, per_row, 0.0)

        acc_ref[0, 0] += jnp.sum(per_row)

        @pl.when(i == n_blocks - 1)
        def _finalize():
            out_ref[0, 0] = acc_ref[0, 0] * jnp.float32(inv_n)

    return kernel


@functools.partial(jax.jit, static_argnames=("margin",))
def contrastive_loss(output_1, output_2, label, margin=_MARGIN):
    """output_1, output_2: (N, D); label: (N, 1). Returns scalar mean loss."""
    N, D = output_1.shape
    assert output_2.shape == (N, D)
    assert label.shape == (N, 1)

    # Row-tile: multiple of 8 (sublane constraint) capped at _MAX_TN, or the
    # full N when N < 8 (block equal to the full dim is also legal).
    if N < 8:
        tn = N
    else:
        tn = min(_MAX_TN, (N // 8) * 8)
    n_blocks = pl.cdiv(N, tn)

    kernel = _make_kernel(N, tn, n_blocks, float(margin), _EPS)

    out = pl.pallas_call(
        kernel,
        out_shape=jax.ShapeDtypeStruct((1, 1), jnp.float32),
        grid=(n_blocks,),
        in_specs=[
            pl.BlockSpec((tn, D), lambda i: (i, 0)),
            pl.BlockSpec((tn, D), lambda i: (i, 0)),
            pl.BlockSpec((tn, 1), lambda i: (i, 0)),
        ],
        out_specs=pl.BlockSpec(memory_space=pltpu.MemorySpace.SMEM),
        scratch_shapes=[pltpu.SMEM((1, 1), jnp.float32)],
        compiler_params=pltpu.CompilerParams(
            dimension_semantics=("arbitrary",)),
    )(output_1, output_2, label)
    return out[0, 0]


def _reference(output_1, output_2, label, margin=_MARGIN):
    diff = (output_1 - output_2).astype(jnp.float32) + _EPS
    dist = jnp.sqrt(jnp.sum(diff * diff, axis=-1, keepdims=True))
    hinge = jnp.maximum(margin - dist, 0.0)
    return jnp.mean((1.0 - label) * dist ** 2 + label * hinge ** 2)


if __name__ == "__main__":
    key = jax.random.PRNGKey(0)

    # Case 1: batch divides the row tile evenly.
    k1, k2, k3, key = jax.random.split(key, 4)
    N, D = 8, 32
    o1 = jax.random.normal(k1, (N, D), dtype=jnp.float32)
    o2 = jax.random.normal(k2, (N, D), dtype=jnp.float32)
    lbl = jax.random.bernoulli(k3, 0.5, (N, 1)).astype(jnp.float32)

    loss = contrastive_loss(o1, o2, lbl)
    jax.block_until_ready(loss)
    ref = _reference(o1, o2, lbl)
    assert jnp.allclose(loss, ref, rtol=1e-5, atol=1e-5), (loss, ref)

    # Case 2: ragged batch (exercises the tail-block mask).
    k1, k2, k3, key = jax.random.split(key, 4)
    N2, D2 = 12, 32
    o1b = jax.random.normal(k1, (N2, D2), dtype=jnp.float32)
    o2b = jax.random.normal(k2, (N2, D2), dtype=jnp.float32)
    lblb = jax.random.bernoulli(k3, 0.5, (N2, 1)).astype(jnp.float32)

    loss2 = contrastive_loss(o1b, o2b, lblb)
    jax.block_until_ready(loss2)
    ref2 = _reference(o1b, o2b, lblb)
    assert jnp.allclose(loss2, ref2, rtol=1e-5, atol=1e-5), (loss2, ref2)

    print("KERNEL_OK")
</pallas_src>

<mosaic_0001>
module attributes {stable_mosaic.version = 11 : i64} {
  func.func @kernel(%arg0: i32, %arg1: memref<8x32xf32, #tpu.memory_space<vmem>>, %arg2: memref<8x32xf32, #tpu.memory_space<vmem>>, %arg3: memref<8x1xf32, #tpu.memory_space<vmem>>, %arg4: memref<1x1xf32, #tpu.memory_space<smem>>, %arg5: memref<1x1xf32, #tpu.memory_space<smem>>) attributes {dimension_semantics = [#tpu.dimension_semantics<arbitrary>], iteration_bounds = array<i64: 1>, scalar_prefetch = 0 : i64, scratch_operands = 1 : i64, tpu.core_type = #tpu.core_type<tc>, window_params = [{transform_indices = @transform_0, window_bounds = array<i64: 8, 32>}, {transform_indices = @transform_1, window_bounds = array<i64: 8, 32>}, {transform_indices = @transform_2, window_bounds = array<i64: 8, 1>}, {transform_indices = @transform_3, window_bounds = array<i64: 1, 1>}]} {
    %c0_i32 = arith.constant 0 : i32
    %0 = arith.cmpi eq, %arg0, %c0_i32 : i32
    %1 = arith.extui %0 : i1 to i32
    %c0_i32_0 = arith.constant 0 : i32
    %2 = arith.cmpi ne, %1, %c0_i32_0 : i32
    scf.if %2 {
      %cst_17 = arith.constant 0.000000e+00 : f32
      %c0_18 = arith.constant 0 : index
      %c0_19 = arith.constant 0 : index
      %33 = memref.load %arg5[%c0_18, %c0_19] : memref<1x1xf32, #tpu.memory_space<smem>>
      memref.store %cst_17, %arg5[%c0_18, %c0_19] : memref<1x1xf32, #tpu.memory_space<smem>>
    } else {
    }
    %c0 = arith.constant 0 : index
    %c0_1 = arith.constant 0 : index
    %3 = vector.load %arg1[%c0, %c0_1] : memref<8x32xf32, #tpu.memory_space<vmem>>, vector<8x32xf32>
    %c0_2 = arith.constant 0 : index
    %c0_3 = arith.constant 0 : index
    %4 = vector.load %arg2[%c0_2, %c0_3] : memref<8x32xf32, #tpu.memory_space<vmem>>, vector<8x32xf32>
    %c0_4 = arith.constant 0 : index
    %c0_5 = arith.constant 0 : index
    %5 = vector.load %arg3[%c0_4, %c0_5] : memref<8x1xf32, #tpu.memory_space<vmem>>, vector<8x1xf32>
    %6 = arith.subf %3, %4 : vector<8x32xf32>
    %cst = arith.constant 9.99999997E-7 : f32
    %7 = vector.broadcast %cst : f32 to vector<8x32xf32>
    %8 = arith.addf %6, %7 : vector<8x32xf32>
    %9 = arith.mulf %8, %8 : vector<8x32xf32>
    %cst_6 = arith.constant dense<0.000000e+00> : vector<8xf32>
    %10 = vector.multi_reduction <add>, %9, %cst_6 [1] : vector<8x32xf32> to vector<8xf32>
    %11 = vector.shape_cast %10 : vector<8xf32> to vector<8x1xf32>
    %12 = math.sqrt %11 : vector<8x1xf32>
    %cst_7 = arith.constant 2.000000e+00 : f32
    %13 = vector.broadcast %cst_7 : f32 to vector<8x1xf32>
    %14 = arith.subf %13, %12 : vector<8x1xf32>
    %cst_8 = arith.constant 0.000000e+00 : f32
    %15 = vector.broadcast %cst_8 : f32 to vector<8x1xf32>
    %16 = arith.maximumf %14, %15 : vector<8x1xf32>
    %cst_9 = arith.constant 1.000000e+00 : f32
    %17 = vector.broadcast %cst_9 : f32 to vector<8x1xf32>
    %18 = arith.subf %17, %5 : vector<8x1xf32>
    %19 = arith.mulf %18, %11 : vector<8x1xf32>
    %20 = arith.mulf %16, %16 : vector<8x1xf32>
    %21 = arith.mulf %5, %20 : vector<8x1xf32>
    %22 = arith.addf %19, %21 : vector<8x1xf32>
    %c0_10 = arith.constant 0 : index
    %c0_11 = arith.constant 0 : index
    %23 = memref.load %arg5[%c0_10, %c0_11] : memref<1x1xf32, #tpu.memory_space<smem>>
    %24 = vector.shape_cast %22 : vector<8x1xf32> to vector<1x8x1xf32>
    %cst_12 = arith.constant dense<0.000000e+00> : vector<1xf32>
    %25 = vector.multi_reduction <add>, %24, %cst_12 [1, 2] : vector<1x8x1xf32> to vector<1xf32>
    %26 = vector.shape_cast %25 : vector<1xf32> to vector<1x1x1xf32>
    %27 = vector.extract %26[0, 0, 0] : f32 from vector<1x1x1xf32>
    %28 = arith.addf %23, %27 : f32
    %c0_13 = arith.constant 0 : index
    %c0_14 = arith.constant 0 : index
    %29 = memref.load %arg5[%c0_13, %c0_14] : memref<1x1xf32, #tpu.memory_space<smem>>
    memref.store %28, %arg5[%c0_13, %c0_14] : memref<1x1xf32, #tpu.memory_space<smem>>
    %c0_i32_15 = arith.constant 0 : i32
    %30 = arith.cmpi eq, %arg0, %c0_i32_15 : i32
    %31 = arith.extui %30 : i1 to i32
    %c0_i32_16 = arith.constant 0 : i32
    %32 = arith.cmpi ne, %31, %c0_i32_16 : i32
    scf.if %32 {
      %c0_17 = arith.constant 0 : index
      %c0_18 = arith.constant 0 : index
      %33 = memref.load %arg5[%c0_17, %c0_18] : memref<1x1xf32, #tpu.memory_space<smem>>
      %cst_19 = arith.constant 1.250000e-01 : f32
      %34 = arith.mulf %33, %cst_19 : f32
      %c0_20 = arith.constant 0 : index
      %c0_21 = arith.constant 0 : index
      %35 = memref.load %arg4[%c0_20, %c0_21] : memref<1x1xf32, #tpu.memory_space<smem>>
      memref.store %34, %arg4[%c0_20, %c0_21] : memref<1x1xf32, #tpu.memory_space<smem>>
    } else {
    }
    return
  }
  func.func @transform_0(%arg0: i32) -> (i32, i32) {
    %c0_i32 = arith.constant 0 : i32
    %c0_i32_0 = arith.constant 0 : i32
    return %arg0, %c0_i32 : i32, i32
  }
  func.func @transform_1(%arg0: i32) -> (i32, i32) {
    %c0_i32 = arith.constant 0 : i32
    %c0_i32_0 = arith.constant 0 : i32
    return %arg0, %c0_i32 : i32, i32
  }
  func.func @transform_2(%arg0: i32) -> (i32, i32) {
    %c0_i32 = arith.constant 0 : i32
    %c0_i32_0 = arith.constant 0 : i32
    return %arg0, %c0_i32 : i32, i32
  }
  func.func @transform_3(%arg0: i32) -> (i32, i32) {
    %c0_i32 = arith.constant 0 : i32
    %c0_i32_0 = arith.constant 0 : i32
    %c0_i32_1 = arith.constant 0 : i32
    return %c0_i32, %c0_i32_0 : i32, i32
  }
}

</mosaic_0001>

<bundles_post_ra>
// kernel: contrastive_loss.1
= control target key start
LH: loop header
LB: loop body
LE: loop exit
PB: predicated region body
PF: predicated region fallthrough
CT: control target
= control target key end

     0   :  { %8 = vsyncpa [#allocation4], 0  ;;  %s187_s0 = inlined_call_operand.vmem [shape: f32[8,32], index: 0, kind: input, shape index: {}]   ;;  %s188_s1 = inlined_call_operand.hbm [shape: f32[8,32], index: 1, kind: input, shape index: {}]   ;;  %s189_s2 = inlined_call_operand.vmem [shape: f32[8,1], index: 2, kind: input, shape index: {}]   ;;  %s190_s3 = inlined_call_operand.hbm [shape: f32[1,1], index: 3, kind: output, shape index: {}]  }
   0x1   :  { %9 = vsyncpa [#allocation5], 0  ;;  %s135_s12 = smov [#allocation3]   ;;  %s99_s16 = scalar_lea.hbm %s188_s1, 128 }
   0x2   :  { %s18_s13 = sshll.u32 %s135_s12, 4  ;;  %p100_p0 = scmp.ne.s32.totalorder %s188_s1, %s99_s16  ;;  %s19_s13 = int_to_ptr.vmem [resolvable:$true] %s18_s13 }
   0x3   :  { %p103_p1 = scmp.lt.u32.totalorder %s99_s16, %s188_s1 }
   0x5   :  { %p105_p2 = pnand %p103_p1, %p100_p0 }
   0x7   :  { %108 = shalt.err (!%p105_p2)
}
   0x8   :  { %s109_s21 = scalar_lea.vmem %s19_s13, 128  ;;  %p114_p4 = scmp.lt.s32.totalorder %s19_s13, %s19_s13 }
   0x9   :  { %p110_p3 = scmp.ne.s32.totalorder %s19_s13, %s109_s21  ;;  %p115_p5 = scmp.lt.s32.totalorder %s109_s21, %s109_s21 }
   0xb   :  { %p116_p6 = por %p115_p5, %p114_p4 }
   0xd   :  { %p117_p7 = pnand %p116_p6, %p110_p3 }
   0xf   :  { %120 = shalt.err (!%p117_p7)
}
  0x10   :  { %21 = dma.hbm_to_vmem [thread:$0]  %s188_s1, 128, %s19_s13, [#allocation4]  }
  0x11   :  { %131 = dma.done.wait [#allocation4], 128  }
  0x12   :  { %132 = vsyncadd [#allocation4], 4294967168  ;;  %v33_v0 = vld [vmem:[%s187_s0] sm:$0xff]  ;;  %vm39_vm0 = vcmask 261120   ;;  %vm58_vm3 = vcmask 7168   ;;  %s121_s29 = scalar_lea.hbm %s190_s3, 16 }
  0x13   :  { %v34_v1 = vld [vmem:[#allocation3] sm:$0xff]  ;;  %p122_p8 = scmp.ne.s32.totalorder %s190_s3, %s121_s29  ;;  %p125_p9 = scmp.lt.u32.totalorder %s121_s29, %s190_s3 }
  0x14   :  { %v36_v2 = vsub.f32 %v33_v0, %v34_v1  ;;  %v35_v11 = vld [vmem:[%s189_s2] sm:$0xff] }
  0x15   :  { %v52_v15 = vsub.f32 1.0, %v35_v11  ;;  %p127_p10 = pnand %p125_p9, %p122_p8 }
  0x16   :  { %v37_v3 = vadd.f32 1e-06, %v36_v2 }
  0x18   :  { %v38_v4 = vmul.f32 %v37_v3, %v37_v3 }
  0x1a   :  { %v40_v5 = vsel %vm39_vm0, %v38_v4, 0.0 }
  0x1b   :  { %41 = vadd.xlane.f32.xlu0 %v40_v5 }
  0xa8   :  { %v42_v6 = vpop.xlane.xlu0 %41 }
  0xa9   :  { %97 = vrsqrt.f32 %v42_v6  ;;  %vm45_vm1 = vcmp.eq.f32.partialorder %v42_v6, inf  ;;  %v48_v9 = vand.u32 2147483648, %v42_v6  ;;  %vm47_vm2 = vcmp.eq.f32.partialorder %v42_v6, 0.0 }
  0xaa   :  { %v53_v17 = vmul.f32 %v52_v15, %v42_v6 }
  0xb3   :  { %v98_v7 = vpop.eup %97 }
  0xb4   :  { %v44_v8 = vmul.f32 %v98_v7, %v42_v6 }
  0xb6   :  { %v46_v10 = vsel %vm45_vm1, %v42_v6, %v44_v8 }
  0xb7   :  { %v49_v12 = vsel %vm47_vm2, %v48_v9, %v46_v10 }
  0xb8   :  { %v50_v13 = vsub.f32 2.0, %v49_v12 }
  0xba   :  { %v51_v14 = vmax.f32 %v50_v13, 0.0 }
  0xbc   :  { %v54_v16 = vmul.f32 %v51_v14, %v51_v14 }
  0xbe   :  { %v55_v18 = vmul.f32 %v54_v16, %v35_v11 }
  0xc0   :  { %v56_v19 = vadd.f32 %v55_v18, %v53_v17 }
  0xc2   :  { %v59_v20 = vsel %vm58_vm3, %v56_v19, 0.0 }
  0xc3   :  { %60 = vadd.xlane.f32.xlu0 %v59_v20 }
 0x150   :  { %v61_v21 = vpop.xlane.xlu0 %60 }
 0x151   :  { %v62_v22 = vrot.slane %v61_v21, 4 }
 0x153   :  { %v63_v23 = vadd.f32 %v62_v22, %v61_v21 }
 0x155   :  { %v64_v24 = vrot.slane %v63_v23, 2 }
 0x157   :  { %v65_v25 = vadd.f32 %v64_v24, %v63_v23 }
 0x159   :  { %v66_v26 = vrot.slane %v65_v25, 1 }
 0x15b   :  { %v67_v27 = vadd.f32 %v66_v26, %v65_v25 }
 0x15d   :  { %93 = vpush %v67_v27 }
 0x18e   :  { %s94_s0 = spop %93 }
 0x18f   :  { %s76_s2 = smul.f32 0.125, %s94_s0 }
 0x191   :  { %78 = sst [smem:[#allocation6]] %s76_s2 }
 0x192   :  { %130 = shalt.err (!%p127_p10)
}
 0x193   :  { %s136_s7 = smov [#allocation6]  }
 0x194   :  { %86 = dma.smem_to_hbm %s136_s7, 16, %s190_s3, [#allocation5]  }
 0x195   :  { %133 = dma.done.wait [#allocation5], 16  }
 0x196   :  { %134 = vsyncadd [#allocation5], 4294967280 }
 0x197   :  { %90 = sfence }
 0x198   :  { %91 = vsyncpa [#allocation4], 1 }
 0x199   :  { %92 = vsyncpa [#allocation5], 1 }

</bundles_post_ra>
